<compile_context>
chip_gen: v6e
topology: v6e:2x2x1
jax: 0.10.0
libtpu: 0.0.40
codegen_flags: <defaults>
</compile_context>

<pallas_src>
import jax
import jax.numpy as jnp
from jax.experimental import pallas as pl
from jax.experimental.pallas import tpu as pltpu

NEG_SLOPE = 0.01   # torch.nn.LeakyReLU() default negative_slope
GIN_EPS = 0.0      # GINConv default eps (train_eps=False)
BN_EPS = 1e-5      # BatchNorm1d default eps
LANE = 128


def _leaky_relu(x):
    return jnp.where(x > 0, x, NEG_SLOPE * x)


def _round_up(n, m):
    return ((n + m - 1) // m) * m


def _pick_tile(n_pad, max_tile, prefer_min_blocks=1):
    """Largest 128-multiple tile that divides n_pad, <= max_tile; prefer a tile that
    leaves at least `prefer_min_blocks` blocks (megacore sharding on v7x)."""
    candidates = [t for t in range(LANE, min(max_tile, n_pad) + 1, LANE)
                  if n_pad % t == 0]
    good = [t for t in candidates if n_pad // t >= prefer_min_blocks]
    return max(good) if good else max(candidates)


def gin_conv_kernel(a_ref, h_ref, w1_ref, b1_ref, w2_ref, b2_ref, out_ref, acc_ref):
    """GINConv dst-row tile, full MLP in finalize.

    agg = sum_k A'[i, k] @ h[k]     (int8 A' upcast to bf16, f32 accumulate)
    out = LeakyReLU(LeakyReLU(agg @ W1' + b1') @ W2 + b2)
    (eval-mode BatchNorm folded into W1'/b1'; (1+eps)I folded into A'.)
    """
    k = pl.program_id(1)

    @pl.when(k == 0)
    def _():
        acc_ref[...] = jnp.zeros_like(acc_ref)

    # int8 -> bf16 upcast is a VPU op with plenty of slack in this HBM-bound loop.
    acc_ref[...] += jnp.dot(a_ref[...].astype(jnp.bfloat16), h_ref[...],
                            preferred_element_type=jnp.float32)

    @pl.when(k == pl.num_programs(1) - 1)
    def _():
        z = jnp.dot(acc_ref[...].astype(jnp.bfloat16), w1_ref[...],
                    preferred_element_type=jnp.float32) + b1_ref[...]
        z = _leaky_relu(z)
        z = jnp.dot(z.astype(jnp.bfloat16), w2_ref[...],
                    preferred_element_type=jnp.float32) + b2_ref[...]
        z = _leaky_relu(z)
        out_ref[...] = z.astype(out_ref.dtype)


def gin_conv_folded_kernel(a_ref, h_ref, b1_ref, w2_ref, b2_ref, out_ref, acc_ref):
    """GINConv dst-row tile where the first Linear was pre-applied to the node
    features in XLA (exact reassociation A'(xW1') = (A'x)W1'), so finalize is:
    out = LeakyReLU(LeakyReLU(agg + b1') @ W2 + b2)."""
    k = pl.program_id(1)

    @pl.when(k == 0)
    def _():
        acc_ref[...] = jnp.zeros_like(acc_ref)

    acc_ref[...] += jnp.dot(a_ref[...].astype(jnp.bfloat16), h_ref[...],
                            preferred_element_type=jnp.float32)

    @pl.when(k == pl.num_programs(1) - 1)
    def _():
        z = _leaky_relu(acc_ref[...] + b1_ref[...])
        z = jnp.dot(z.astype(jnp.bfloat16), w2_ref[...],
                    preferred_element_type=jnp.float32) + b2_ref[...]
        z = _leaky_relu(z)
        out_ref[...] = z.astype(out_ref.dtype)


def gin_conv(a_i8, h, w1, b1, w2, b2, *, out_dtype, max_tile=512):
    """Tiled GINConv: streams int8 A' once, keeps bf16 weights resident in VMEM.

    w1=None -> first Linear already folded into h (conv1 path).
    """
    n_pad = a_i8.shape[0]
    fdim = h.shape[1]
    hidden = w2.shape[1]

    # >=2 dst tiles when possible so the parallel axis shards across v7x's 2 TCs.
    tm = _pick_tile(n_pad, max_tile, prefer_min_blocks=2)
    tk = _pick_tile(n_pad, max_tile, prefer_min_blocks=1)
    grid = (n_pad // tm, n_pad // tk)

    base_specs = [
        pl.BlockSpec((tm, tk), lambda i, k: (i, k)),       # A' tile (int8)
        pl.BlockSpec((tk, fdim), lambda i, k: (k, 0)),      # node features (bf16)
    ]
    if w1 is None:
        kernel = gin_conv_folded_kernel
        in_specs = base_specs + [
            pl.BlockSpec(b1.shape, lambda i, k: (0, 0)),    # b1' (f32)
            pl.BlockSpec(w2.shape, lambda i, k: (0, 0)),    # W2 (bf16)
            pl.BlockSpec(b2.shape, lambda i, k: (0, 0)),    # b2 (f32)
        ]
        args = (a_i8, h, b1, w2, b2)
    else:
        kernel = gin_conv_kernel
        in_specs = base_specs + [
            pl.BlockSpec(w1.shape, lambda i, k: (0, 0)),    # W1' (bf16, BN folded)
            pl.BlockSpec(b1.shape, lambda i, k: (0, 0)),    # b1' (f32)
            pl.BlockSpec(w2.shape, lambda i, k: (0, 0)),    # W2 (bf16)
            pl.BlockSpec(b2.shape, lambda i, k: (0, 0)),    # b2 (f32)
        ]
        args = (a_i8, h, w1, b1, w2, b2)

    return pl.pallas_call(
        kernel,
        out_shape=jax.ShapeDtypeStruct((n_pad, hidden), out_dtype),
        grid_spec=pltpu.PrefetchScalarGridSpec(
            num_scalar_prefetch=0,
            grid=grid,
            in_specs=in_specs,
            out_specs=pl.BlockSpec((tm, hidden), lambda i, k: (i, 0)),
            scratch_shapes=[pltpu.VMEM((tm, hidden), jnp.float32)],
        ),
        compiler_params=pltpu.CompilerParams(
            # dst-row tiles shard across v7x's 2 TensorCores; reduction axis serial.
            dimension_semantics=("parallel", "arbitrary"),
            # Safe on v7x's 64 MiB physical VMEM; tiles capped at 512 stay well below.
            vmem_limit_bytes=48 * 1024 * 1024,
        ),
    )(*args)


def gin_forward(x, A, P, params, *, max_tile=512):
    """Full forward: conv1 -> conv2 -> global_add_pool -> ffn (eval mode).

    NOTE: int8 A' requires per-pair edge multiplicity + diagonal <= 127.
    """
    n, c = x.shape
    x = x.astype(jnp.float32)                      # x.float() in the reference

    # Pad node count to a 128-multiple (decoupled from the tile size).
    n_pad = _round_up(n, LANE)

    # Fold eval-mode BatchNorm (running stats) into the first Linear of each MLP.
    w11 = params["w11"] * params["s1"]             # [c, H]
    b11 = params["b11"] * params["s1"] + params["t1"]
    w21 = params["w21"] * params["s2"]             # [H, H]
    b21 = params["b21"] * params["s2"] + params["t2"]

    # A' = A + (1 + eps) * I, zero-padded, stored int8 (exact for counts <= 127).
    a_hat = A + (1.0 + GIN_EPS) * jnp.eye(n, dtype=A.dtype)
    a_hat = jnp.pad(a_hat, ((0, n_pad - n), (0, n_pad - n))).astype(jnp.int8)

    # conv1 reassociation: (A'x)W11' == A'(xW11'); tiny [n,c]x[c,H] matmul in XLA.
    h0 = jnp.dot(x, w11, preferred_element_type=jnp.float32)          # [n, H]
    h0 = jnp.pad(h0, ((0, n_pad - n), (0, 0))).astype(jnp.bfloat16)   # [n_pad, H]

    p_pad = jnp.pad(P.astype(jnp.float32), ((0, 0), (0, n_pad - n)))  # [G, n_pad]

    w12 = params["w12"].astype(jnp.bfloat16)
    w22 = params["w22"].astype(jnp.bfloat16)
    w21_bf = w21.astype(jnp.bfloat16)

    # GINConv 1 (folded first Linear; bf16 output feeds conv2's bf16 aggregation).
    h1 = gin_conv(a_hat, h0, None, b11, w12, params["b12"],
                  out_dtype=jnp.bfloat16, max_tile=max_tile)
    # GINConv 2 (full MLP in finalize; f32 output for pooling / ffn).
    h2 = gin_conv(a_hat, h1, w21_bf, b21, w22, params["b22"],
                  out_dtype=jnp.float32, max_tile=max_tile)

    # global_add_pool + ffn (Dropout is identity in eval). Padded nodes contribute
    # nothing because P has zero columns there. Hoisted to XLA: out_neurons=1 would
    # otherwise force lane-sparse masked stores in-kernel.
    pooled = jnp.dot(p_pad, h2, preferred_element_type=jnp.float32)     # [G, H]
    return jnp.dot(pooled, params["wf"],
                   preferred_element_type=jnp.float32) + params["bf"]   # [G, out]


def init_params(key, in_channels, gnn_dim, out_neurons):
    """Deterministic parameter init (PyTorch Linear-style uniform bounds)."""
    def linear(k, fan_in, fan_out):
        k1, k2 = jax.random.split(k)
        bound = 1.0 / jnp.sqrt(jnp.float32(fan_in))
        w = jax.random.uniform(k1, (fan_in, fan_out), jnp.float32, -bound, bound)
        b = jax.random.uniform(k2, (1, fan_out), jnp.float32, -bound, bound)
        return w, b

    keys = jax.random.split(key, 5)
    w11, b11 = linear(keys[0], in_channels, gnn_dim)
    w12, b12 = linear(keys[1], gnn_dim, gnn_dim)
    w21, b21 = linear(keys[2], gnn_dim, gnn_dim)
    w22, b22 = linear(keys[3], gnn_dim, gnn_dim)
    wf, bf = linear(keys[4], gnn_dim, out_neurons)

    # BatchNorm1d default state: gamma=1, beta=0, running_mean=0, running_var=1.
    gamma = jnp.ones((1, gnn_dim), jnp.float32)
    beta = jnp.zeros((1, gnn_dim), jnp.float32)
    mean = jnp.zeros((1, gnn_dim), jnp.float32)
    var = jnp.ones((1, gnn_dim), jnp.float32)
    scale = gamma / jnp.sqrt(var + BN_EPS)     # folded eval-mode BN: y = x*scale + shift
    shift = beta - mean * scale

    return dict(w11=w11, b11=b11, s1=scale, t1=shift, w12=w12, b12=b12,
                w21=w21, b21=b21, s2=scale, t2=shift, w22=w22, b22=b22,
                wf=wf, bf=bf)


if __name__ == "__main__":
    # Small, deterministic synthetic graph batch (gnn_dim = 128 per module default).
    num_nodes = 300           # pads to 384 (128-multiple); tiles: tm=128, tk=384
    num_edges = 900
    in_channels = 16
    gnn_dim = 128
    num_graphs = 2
    out_neurons = 1

    key = jax.random.PRNGKey(0)
    k_x, k_src, k_dst, k_params = jax.random.split(key, 4)

    x = jax.random.normal(k_x, (num_nodes, in_channels), jnp.float32)

    # edge_index equivalent: [2, E]; dense adjacency A[dst, src] += 1 (add aggregation).
    src = jax.random.randint(k_src, (num_edges,), 0, num_nodes)
    dst = jax.random.randint(k_dst, (num_edges,), 0, num_nodes)
    A = jnp.zeros((num_nodes, num_nodes), jnp.float32).at[dst, src].add(1.0)

    # int8 A' requires multiplicity + diagonal <= 127 (exactness guard).
    assert float(A.max()) + 1.0 <= 127.0, "edge multiplicity too large for int8 A'"

    # batch vector: first half of nodes -> graph 0, second half -> graph 1.
    batch = jnp.concatenate([
        jnp.zeros(num_nodes // 2, jnp.int32),
        jnp.ones(num_nodes - num_nodes // 2, jnp.int32),
    ])
    P = (batch[None, :] == jnp.arange(num_graphs)[:, None]).astype(jnp.float32)

    params = init_params(k_params, in_channels, gnn_dim, out_neurons)

    out = gin_forward(x, A, P, params, max_tile=512)
    jax.block_until_ready(out)
    assert out.shape == (num_graphs, out_neurons)
    print("KERNEL_OK")
</pallas_src>

<mosaic_0001>
module attributes {stable_mosaic.version = 11 : i64} {
  func.func @gin_conv_folded_kernel(%arg0: i32, %arg1: i32, %arg2: memref<128x384xi8, #tpu.memory_space<vmem>>, %arg3: memref<384x128xbf16, #tpu.memory_space<vmem>>, %arg4: memref<1x128xf32, #tpu.memory_space<vmem>>, %arg5: memref<128x128xbf16, #tpu.memory_space<vmem>>, %arg6: memref<1x128xf32, #tpu.memory_space<vmem>>, %arg7: memref<128x128xbf16, #tpu.memory_space<vmem>>, %arg8: memref<128x128xf32, #tpu.memory_space<vmem>>) attributes {dimension_semantics = [#tpu.dimension_semantics<parallel>, #tpu.dimension_semantics<arbitrary>], iteration_bounds = array<i64: 3, 1>, scalar_prefetch = 0 : i64, scratch_operands = 1 : i64, tpu.core_type = #tpu.core_type<tc>, window_params = [{transform_indices = @transform_0, window_bounds = array<i64: 128, 384>}, {transform_indices = @transform_1, window_bounds = array<i64: 384, 128>}, {pipeline_mode = #tpu.pipeline_mode<synchronous>, transform_indices = @transform_2, window_bounds = array<i64: 1, 128>}, {pipeline_mode = #tpu.pipeline_mode<synchronous>, transform_indices = @transform_3, window_bounds = array<i64: 128, 128>}, {pipeline_mode = #tpu.pipeline_mode<synchronous>, transform_indices = @transform_4, window_bounds = array<i64: 1, 128>}, {transform_indices = @transform_5, window_bounds = array<i64: 128, 128>}]} {
    %c0_i32 = arith.constant 0 : i32
    %0 = arith.cmpi eq, %arg1, %c0_i32 : i32
    %1 = arith.extui %0 : i1 to i32
    %c0_i32_0 = arith.constant 0 : i32
    %2 = arith.cmpi ne, %1, %c0_i32_0 : i32
    scf.if %2 {
      %cst_10 = arith.constant 0.000000e+00 : f32
      %13 = vector.broadcast %cst_10 : f32 to vector<128x128xf32>
      %c0_11 = arith.constant 0 : index
      %c0_12 = arith.constant 0 : index
      %14 = vector.load %arg8[%c0_11, %c0_12] : memref<128x128xf32, #tpu.memory_space<vmem>>, vector<128x128xf32>
      tpu.vector_store %arg8[%c0_11, %c0_12], %13 {strides = array<i32>} : memref<128x128xf32, #tpu.memory_space<vmem>>, vector<128x128xf32>,
    } else {
    }
    %c0 = arith.constant 0 : index
    %c0_1 = arith.constant 0 : index
    %3 = vector.load %arg8[%c0, %c0_1] : memref<128x128xf32, #tpu.memory_space<vmem>>, vector<128x128xf32>
    %c0_2 = arith.constant 0 : index
    %c0_3 = arith.constant 0 : index
    %4 = vector.load %arg2[%c0_2, %c0_3] : memref<128x384xi8, #tpu.memory_space<vmem>>, vector<128x384xi8>
    %5 = arith.sitofp %4 : vector<128x384xi8> to vector<128x384xbf16>
    %c0_4 = arith.constant 0 : index
    %c0_5 = arith.constant 0 : index
    %6 = vector.load %arg3[%c0_4, %c0_5] : memref<384x128xbf16, #tpu.memory_space<vmem>>, vector<384x128xbf16>
    %cst = arith.constant dense<0.000000e+00> : vector<128x128xf32>
    %7 = tpu.matmul %5, %6, %cst {dimension_numbers = #tpu.dot_dimension_numbers<[1], [0], [0], [1], [0, 0, 1, 1], [], []>} : vector<128x384xbf16>, vector<384x128xbf16>, vector<128x128xf32> -> vector<128x128xf32>
    %8 = arith.addf %3, %7 : vector<128x128xf32>
    %c0_6 = arith.constant 0 : index
    %c0_7 = arith.constant 0 : index
    %9 = vector.load %arg8[%c0_6, %c0_7] : memref<128x128xf32, #tpu.memory_space<vmem>>, vector<128x128xf32>
    tpu.vector_store %arg8[%c0_6, %c0_7], %8 {strides = array<i32>} : memref<128x128xf32, #tpu.memory_space<vmem>>, vector<128x128xf32>,
    %c0_i32_8 = arith.constant 0 : i32
    %10 = arith.cmpi eq, %arg1, %c0_i32_8 : i32
    %11 = arith.extui %10 : i1 to i32
    %c0_i32_9 = arith.constant 0 : i32
    %12 = arith.cmpi ne, %11, %c0_i32_9 : i32
    scf.if %12 {
      %c0_10 = arith.constant 0 : index
      %c0_11 = arith.constant 0 : index
      %13 = vector.load %arg8[%c0_10, %c0_11] : memref<128x128xf32, #tpu.memory_space<vmem>>, vector<128x128xf32>
      %c0_12 = arith.constant 0 : index
      %c0_13 = arith.constant 0 : index
      %14 = vector.load %arg4[%c0_12, %c0_13] : memref<1x128xf32, #tpu.memory_space<vmem>>, vector<1x128xf32>
      %15 = vector.broadcast %14 : vector<1x128xf32> to vector<128x128xf32>
      %16 = arith.addf %13, %15 : vector<128x128xf32>
      %cst_14 = arith.constant 0.000000e+00 : f32
      %17 = vector.broadcast %cst_14 : f32 to vector<128x128xf32>
      %18 = arith.cmpf ogt, %16, %17 : vector<128x128xf32>
      %cst_15 = arith.constant 0.00999999977 : f32
      %19 = vector.broadcast %cst_15 : f32 to vector<128x128xf32>
      %20 = arith.mulf %19, %16 : vector<128x128xf32>
      %21 = arith.select %18, %16, %20 : vector<128x128xi1>, vector<128x128xf32>
      %22 = arith.truncf %21 : vector<128x128xf32> to vector<128x128xbf16>
      %c0_16 = arith.constant 0 : index
      %c0_17 = arith.constant 0 : index
      %23 = vector.load %arg5[%c0_16, %c0_17] : memref<128x128xbf16, #tpu.memory_space<vmem>>, vector<128x128xbf16>
      %cst_18 = arith.constant dense<0.000000e+00> : vector<128x128xf32>
      %24 = tpu.matmul %22, %23, %cst_18 {dimension_numbers = #tpu.dot_dimension_numbers<[1], [0], [0], [1], [0, 0, 1, 1], [], []>} : vector<128x128xbf16>, vector<128x128xbf16>, vector<128x128xf32> -> vector<128x128xf32>
      %c0_19 = arith.constant 0 : index
      %c0_20 = arith.constant 0 : index
      %25 = vector.load %arg6[%c0_19, %c0_20] : memref<1x128xf32, #tpu.memory_space<vmem>>, vector<1x128xf32>
      %26 = vector.broadcast %25 : vector<1x128xf32> to vector<128x128xf32>
      %27 = arith.addf %24, %26 : vector<128x128xf32>
      %cst_21 = arith.constant 0.000000e+00 : f32
      %28 = vector.broadcast %cst_21 : f32 to vector<128x128xf32>
      %29 = arith.cmpf ogt, %27, %28 : vector<128x128xf32>
      %cst_22 = arith.constant 0.00999999977 : f32
      %30 = vector.broadcast %cst_22 : f32 to vector<128x128xf32>
      %31 = arith.mulf %30, %27 : vector<128x128xf32>
      %32 = arith.select %29, %27, %31 : vector<128x128xi1>, vector<128x128xf32>
      %33 = arith.truncf %32 : vector<128x128xf32> to vector<128x128xbf16>
      %c0_23 = arith.constant 0 : index
      %c0_24 = arith.constant 0 : index
      %34 = vector.load %arg7[%c0_23, %c0_24] : memref<128x128xbf16, #tpu.memory_space<vmem>>, vector<128x128xbf16>
      tpu.vector_store %arg7[%c0_23, %c0_24], %33 {strides = array<i32>} : memref<128x128xbf16, #tpu.memory_space<vmem>>, vector<128x128xbf16>,
    } else {
    }
    return
  }
  func.func @transform_0(%arg0: i32, %arg1: i32) -> (i32, i32) {
    %c0_i32 = arith.constant 0 : i32
    return %arg0, %arg1 : i32, i32
  }
  func.func @transform_1(%arg0: i32, %arg1: i32) -> (i32, i32) {
    %c0_i32 = arith.constant 0 : i32
    %c0_i32_0 = arith.constant 0 : i32
    return %arg1, %c0_i32 : i32, i32
  }
  func.func @transform_2(%arg0: i32, %arg1: i32) -> (i32, i32) {
    %c0_i32 = arith.constant 0 : i32
    %c0_i32_0 = arith.constant 0 : i32
    %c0_i32_1 = arith.constant 0 : i32
    return %c0_i32, %c0_i32_0 : i32, i32
  }
  func.func @transform_3(%arg0: i32, %arg1: i32) -> (i32, i32) {
    %c0_i32 = arith.constant 0 : i32
    %c0_i32_0 = arith.constant 0 : i32
    %c0_i32_1 = arith.constant 0 : i32
    return %c0_i32, %c0_i32_0 : i32, i32
  }
  func.func @transform_4(%arg0: i32, %arg1: i32) -> (i32, i32) {
    %c0_i32 = arith.constant 0 : i32
    %c0_i32_0 = arith.constant 0 : i32
    %c0_i32_1 = arith.constant 0 : i32
    return %c0_i32, %c0_i32_0 : i32, i32
  }
  func.func @transform_5(%arg0: i32, %arg1: i32) -> (i32, i32) {
    %c0_i32 = arith.constant 0 : i32
    %c0_i32_0 = arith.constant 0 : i32
    return %arg0, %c0_i32 : i32, i32
  }
}

</mosaic_0001>

<bundles_post_ra>
// kernel: tpu_custom_call.1
= control target key start
LH: loop header
LB: loop body
LE: loop exit
PB: predicated region body
PF: predicated region fallthrough
CT: control target
= control target key end

     0   :  { %s2179_s0 = inlined_call_operand.hbm [shape: s8[384,384], index: 0, kind: input, shape index: {}]   ;;  %s2180_s1 = inlined_call_operand.hbm [shape: bf16[384,128], index: 1, kind: input, shape index: {}]   ;;  %s2181_s2 = inlined_call_operand.vmem [shape: f32[1,128], index: 2, kind: input, shape index: {}]   ;;  %s2182_s3 = inlined_call_operand.hbm [shape: bf16[128,128], index: 3, kind: input, shape index: {}]   ;;  %s2183_s4 = inlined_call_operand.vmem [shape: f32[1,128], index: 4, kind: input, shape index: {}]   ;;  %s2184_s5 = inlined_call_operand.hbm [shape: bf16[384,128], index: 5, kind: output, shape index: {}]  }
   0x1   :  { %2188 = sst [smem:[#allocation13_spill]] %s2180_s1 }
   0x2   :  { %2189 = sst [smem:[#allocation14_spill]] %s2182_s3 }
   0x3   :  { %10 = vsyncpa [#allocation4], 0 }
   0x4   :  { %12 = vsyncpa [#allocation4 + $0x1], 0 }
   0x5   :  { %13 = vsyncpa [#allocation7], 0 }
   0x6   :  { %14 = vsyncpa [#allocation5], 0 }
   0x7   :  { %16 = vsyncpa [#allocation5 + $0x1], 0  ;;  %s1927_s18 = smov 0   ;;  %s1929_s19 = smov 0  }
   0x8   :  { %s1931_s20 = smov 0   ;;  %s1933_s21 = smov 0  }
   0x9   :  { %s1935_s22 = smov 0   ;;  %s1937_s23 = smov 0  }
   0xa LB: > { %s1305_s24 = sadd.s32 4294967295, %s1885_s23   ;;  %s1306_s25 = sadd.s32 4294967294, %s1885_s23   ;;  %s1885_s23 = sphi %s1937_s23, %s22_s23   ;;  %s1881_s22 = sphi %s1935_s22, %s2207_s22   ;;  %s1877_s21 = sphi %s1933_s21, %s2206_s21   ;;  %s1873_s20 = sphi %s1931_s20, %s2205_s20   ;;  %s1869_s19 = sphi %s1929_s19, %s2204_s19   ;;  %s1865_s18 = sphi %s1927_s18, %s2203_s18  }
   0xb   : > { %p56_p0 = scmp.ne.s32.totalorder %s1869_s19, %s1865_s18  ;;  %p1961_p1 = scmp.eq.s32.totalorder %s1305_s24, 0 }
   0xc   : > { %p1965_p2 = scmp.eq.s32.totalorder %s1305_s24, 2  ;;  %p175_p3 = scmp.eq.s32.totalorder %s1306_s25, 2 }
   0xd   : > { %s2190_s26 = scalar_select %p1961_p1, 1, 0 }
   0xe   : > { %p1971_p4 = por %p1961_p1, %p56_p0  ;;  %p1307_p5 = scmp.ge.s32.totalorder %s1885_s23, 1 }
   0xf   : > { %p1976_p6 = por %p175_p3, %p56_p0  ;;  %p182_p7 = scmp.lt.s32.totalorder %s1885_s23, 4 }
  0x10   : > { %s2192_s28 = scalar_select %p1971_p4, 1, 0 }
  0x11   : > { %s2193_s29 = scalar_select %p1976_p6, 1, 0 }
  0x12   : > { %p1981_p8 = pnand %p1307_p5, %p182_p7  ;;  %s1887_s6 = smov [#allocation6]  }
  0x13   : > { %s197_s7 = sshll.u32 %s1887_s6, 4  ;;  %s1888_s9 = smov [#allocation8]   ;;  %s198_s7 = int_to_ptr.vmem [resolvable:$true] %s197_s7 }
  0x14   : > { %p1612_p9 = pneg %p1981_p8  ;;  %s213_s10 = sshll.u32 %s1888_s9, 4  ;;  %s214_s10 = int_to_ptr.vmem [resolvable:$true] %s213_s10 }
  0x15   : > { %s1732_s11 = scalar_lea.vmem %s198_s7, 3072  ;;  %p1740_p3 = scmp.lt.s32.totalorder %s198_s7, %s198_s7 }
  0x16   : > { %p1989_p10 = pnand %p1612_p9, %p1961_p1  ;;  %p1733_p12 = scmp.ne.s32.totalorder %s198_s7, %s1732_s11 }
  0x17   : > { %p1741_p5 = scmp.lt.s32.totalorder %s1732_s11, %s1732_s11 }
  0x18   : > { %p1723_p11 = pneg %p1989_p10 }
  0x19   : > { %p1742_p7 = por %p1741_p5, %p1740_p3 }
  0x1a   : > { %p1735_p13 = pnand %p1733_p12, %p1723_p11 }
  0x1c   : > { %p1736_p0 = pneg %p1735_p13 }
  0x1e   : > { %p1743_p9 = pnand %p1742_p7, %p1736_p0 }
  0x20   : > { %1746 = shalt.err (!%p1743_p9)
}
  0x21   : > { %s1889_s12 = smov 64   ;;  %s1890_s13 = smov 4  }
  0x22   : > { %s2196_s1 = sld [smem:[#allocation13_spill]]  ;;  %s1758_s16 = scalar_lea.vmem %s214_s10, 1024 }
  0x23   : > { %p1759_p6 = scmp.ne.s32.totalorder %s214_s10, %s1758_s16  ;;  %p1766_p1 = scmp.lt.s32.totalorder %s214_s10, %s214_s10 }
  0x24   : > { %p1767_p4 = scmp.lt.s32.totalorder %s1758_s16, %s1758_s16 }
  0x25   : > { %p1761_p12 = pnand %p1759_p6, %p1723_p11 }
  0x26   : > { %p1768_p3 = por %p1767_p4, %p1766_p1 }
  0x27   : > { %p1762_p13 = pneg %p1761_p12 }
  0x28   : > { %1615 = dma.hbm_to_vmem [thread:$0]  (!%p1989_p10), %s2196_s1, 3072, %s198_s7, [#allocation7], %s1889_s12, %s1889_s12, %s1890_s13  }
  0x29   : > { %p1769_p0 = pnand %p1768_p3, %p1762_p13 }
  0x2b   : > { %1772 = shalt.err (!%p1769_p0)
}
  0x2c   : > { %s2197_s3 = sld [smem:[#allocation14_spill]]  ;;  %s34_s25 = sadd.s32 1, %s1881_s22 }
  0x2d   : > { %s43_s6 = sadd.s32 1, %s1873_s20  ;;  %p36_p1 = scmp.ge.s32.totalorder %s34_s25, 3 }
  0x2e   : > { %p50_p4 = scmp.ne.s32.totalorder %s1873_s20, %s1869_s19  ;;  %p51_p6 = scmp.eq.s32.totalorder %s1885_s23, 0 }
  0x2f   : > { %p1629_p11 = scmp.lt.s32.totalorder %s1885_s23, 3  ;;  %s2209_s25 = smov (%p36_p1, %s34_s25), 0 }
  0x30   : > { %p52_p5 = por %p51_p6, %p50_p4  ;;  %p2021_p7 = por %p1965_p2, %p50_p4 }
  0x31   : > { %s38_s8 = ssub.s32 %s1881_s22, %s2209_s25  ;;  %s230_s9 = sand.u32 1, %s1873_s20  }
  0x32   : > { %1618 = dma.hbm_to_vmem [thread:$0]  (!%p1989_p10), %s2197_s3, 1024, %s214_s10, [#allocation7], %s1889_s12, %s1889_s12, %s1890_s13  }
  0x33   : > { %p41_p9 = scmp.eq.s32.totalorder %s38_s8, 0  ;;  %s1597_s10 = smul.u32 96, %s230_s9 }
  0x34   : > { %p2028_p10 = pnand %p1629_p11, %p52_p5  ;;  %s1598_s13 = smul.u32 1536, %s1881_s22 }
  0x35   : > { %s2033_s12 = scalar_select %p41_p9, %s1873_s20, %s43_s6  }
  0x36   : > { %s234_s14 = scalar_lea.vmem [#allocation3], %s1597_s10  ;;  %s243_s17 = scalar_lea.hbm %s2179_s0, %s1598_s13 }
  0x37   : > { %s244_s15 = sshll.u32 %s234_s14, 4  ;;  %s231_s24 = scalar_lea.sflag [#allocation4], %s230_s9  ;;  %s245_s15 = int_to_ptr.vmem [resolvable:$true] %s244_s15 }
  0x38   : > { %p1775_p2 = pneg %p2028_p10  ;;  %s1786_s8 = scalar_lea.vmem %s245_s15, 1536 }
  0x39   : > { %p1787_p12 = scmp.ne.s32.totalorder %s245_s15, %s1786_s8  ;;  %s1891_s1 = smov [#allocation3]  }
  0x3a   : > { %s1791_s3 = sshll.u32 %s1891_s1, 4  ;;  %s1792_s3 = int_to_ptr.vmem [resolvable:$false] %s1791_s3 }
  0x3b   : > { %p1789_p13 = pnand %p1787_p12, %p1775_p2  ;;  %s1793_s6 = scalar_lea.vmem %s1792_s3, 3072 }
  0x3c   : > { %p1794_p0 = scmp.lt.s32.totalorder %s245_s15, %s1792_s3  ;;  %p1795_p1 = scmp.lt.s32.totalorder %s1793_s6, %s1786_s8 }
  0x3d   : > { %p1790_p3 = pneg %p1789_p13 }
  0x3e   : > { %p1796_p4 = por %p1795_p1, %p1794_p0 }
  0x40   : > { %p1797_p6 = pnand %p1796_p4, %p1790_p3 }
  0x42   : > { %1800 = shalt.err (!%p1797_p6)
}
  0x43   : > { %s1892_s10 = smov 384   ;;  %s1893_s13 = smov 24  }
  0x44   : > { %1622 = dma.hbm_to_vmem [thread:$0]  (!%p2028_p10), %s243_s17, 1536, %s245_s15, %s231_s24, %s1892_s10, %s1892_s10, %s1893_s13  }
  0x45   : > { %256 = sbr.rel (%p1981_p8) target bundleno = 597 (0x255), region = 40  ;;  %s2046_s9 = sand.u32 (!%p1981_p8), 1, %s1869_s19  }
  0x46   : > { %s1599_s1 = smul.u32 (!%p1981_p8), 96, %s2046_s9  ;;  %s259_s3 = scalar_lea.sflag (!%p1981_p8), [#allocation4], %s2046_s9 }
  0x47   : > { %p2200_p11 = scmp.ne.s32.totalorder (!%p1981_p8), %s2192_s28, 0 }
  0x48   : > { %s2050_s14 = scalar_lea.vmem (!%p1981_p8), [#allocation3], %s1599_s1 }
  0x4a   : > { %1852 = dma.done.wait (%p2200_p11), %s259_s3, 1536  }
  0x4b   : > { %1854 = vsyncadd (%p2200_p11), %s259_s3, 4294965760  ;;  %p2201_p5 = scmp.ne.s32.totalorder %s2190_s26, 0 }
  0x4d   : > { %1856 = dma.done.wait (%p2201_p5), [#allocation7], 4096  }
  0x4e   : > { %1858 = vsyncadd (%p2201_p5), [#allocation7], 4294963200  ;;  %v1689_v0 = vld [vmem:[#allocation6 + $0x78] sm:$0xff]   ;;  %v1692_v3 = vld [vmem:[#allocation6 + $0x70] sm:$0xff]   ;;  %s1317_s15 = sshll.u32 %s2046_s9, 6  ;;  %s1389_s27 = sshll.u32 %s1877_s21, 10 }
  0x4f   : > { %v1690_v1 = vld [vmem:[#allocation6 + $0x38] sm:$0xff]   ;;  %1437 = vmatprep.subr.bf16.mxu0 %v1689_v0  ;;  %v1693_v4 = vld [vmem:[#allocation6 + $0x30] sm:$0xff]   ;;  %v1695_v6 = vld [vmem:[#allocation6 + $0x68] sm:$0xff]   ;;  %s2103_s16 = scalar_lea.vmem [#allocation9], %s1317_s15  ;;  %s2128_s6 = scalar_lea.hbm %s2184_s5, %s1389_s27 }
  0x50   : > { %v1691_v2 = vld [vmem:[#allocation6 + $0xb8] sm:$0xff]   ;;  %1438 = vmatpush3.bf16.msra.mxu0 %v1690_v1  ;;  %v1694_v5 = vld [vmem:[#allocation6 + $0xb0] sm:$0xff]   ;;  %v1696_v7 = vld [vmem:[#allocation6 + $0x28] sm:$0xff]   ;;  %s1200_s17 = sshll.u32 %s2103_s16, 4  ;;  %s1187_s21 = scalar_lea.sflag [#allocation5], %s2046_s9  ;;  %s2130_s17 = int_to_ptr.vmem [resolvable:$true] %s1200_s17 }
  0x51   : > { %1533 = vmatprep.subr.bf16.mxu1 %v1691_v2  ;;  %1439 = vmatprep.subr.bf16.mxu0 %v1692_v3  ;;  %v1697_v8 = vld [vmem:[#allocation6 + $0xa8] sm:$0xff]   ;;  %v1698_v9 = vld [vmem:[#allocation6 + $0x60] sm:$0xff]   ;;  %v1701_v12 = vld [vmem:[#allocation6 + $0x58] sm:$0xff]   ;;  %s1801_s10 = scalar_lea.vmem %s2130_s17, 1024  ;;  %s1894_s13 = smov [#allocation9]  }
  0x52   : > { %1534 = vmatpush3.bf16.msra.mxu1 %v1691_v2  ;;  %v1699_v10 = vld [vmem:[#allocation6 + $0x20] sm:$0xff]   ;;  %v1703_v13 = vld [vmem:[#allocation6 + $0x98] sm:$0xff]   ;;  %v1704_v15 = vld [vmem:[#allocation6 + $0x50] sm:$0xff]   ;;  %p1802_p8 = scmp.ne.s32.totalorder %s2130_s17, %s1801_s10  ;;  %s1805_s1 = sshll.u32 %s1894_s13, 4  ;;  %s1806_s1 = int_to_ptr.vmem [resolvable:$false] %s1805_s1 }
  0x53   : > { %1535 = vmatprep.subr.bf16.mxu1 %v1694_v5  ;;  %v1700_v11 = vld [vmem:[#allocation6 + $0xa0] sm:$0xff]   ;;  %v1702_v14 = vld [vmem:[#allocation6 + $0x18] sm:$0xff]   ;;  %v1706_v16 = vld [vmem:[#allocation6 + $0x90] sm:$0xff]   ;;  %s1807_s3 = scalar_lea.vmem %s1806_s1, 2048  ;;  %p1808_p2 = scmp.lt.s32.totalorder %s2130_s17, %s1806_s1 }
  0x54   : > { %1440 = vmatpush3.bf16.msra.mxu0 %v1693_v4  ;;  %v1705_v17 = vld [vmem:[#allocation6 + $0x10] sm:$0xff]   ;;  %v1707_v18 = vld [vmem:[#allocation6 + $0x48] sm:$0xff]   ;;  %v1710_v21 = vld [vmem:[#allocation6 + $0x40] sm:$0xff]   ;;  %p1803_p9 = pnand %p1802_p8, %p2021_p7  ;;  %p1809_p12 = scmp.lt.s32.totalorder %s1807_s3, %s1801_s10 }
  0x55   : > { %1441 = vmatprep.subr.bf16.mxu0 %v1695_v6  ;;  %v1709_v19 = vld [vmem:[#allocation6 + $0x88] sm:$0xff]   ;;  %v340_v23 = vld [vmem:[%s2050_s14 + $0x10] sm:$0xff]  ;;  %v1712_v26 = vld [vmem:[#allocation6 + $0x80] sm:$0xff]  }
  0x56   : > { %1536 = vmatpush3.bf16.msra.mxu1 %v1694_v5  ;;  %v1708_v20 = vld [vmem:[#allocation6 + $0x8] sm:$0xff]   ;;  %v352_v25 = vunpack.c.l.s8.bf16 %v340_v23  ;;  %v1711_v27 = vld [vmem:[#allocation6] sm:$0xff]   ;;  %v1713_v30 = vld [vmem:[#allocation8 + $0x38] sm:$0xff]   ;;  %v355_v33 = vunpack.c.h.s8.bf16 %v340_v23  ;;  %p1804_p10 = pneg %p1803_p9  ;;  %p1810_p13 = por %p1809_p12, %p1808_p2 }
  0x57   : > { %1537 = vmatprep.subr.bf16.mxu1 %v1697_v8  ;;  %v339_v22 = vld [vmem:[%s2050_s14 + $0x8] sm:$0xff]  ;;  %v338_v28 = vld [vmem:[%s2050_s14] sm:$0xff]  ;;  %v1714_v35 = vld [vmem:[#allocation8 + $0x30] sm:$0xff]  }
  0x58   : > { %1442 = vmatpush3.bf16.msra.mxu0 %v1696_v7  ;;  %v351_v24 = vunpack.c.l.s8.bf16 %v339_v22  ;;  %1549 = vmatprep.mubr.bf16.mxu1 %v352_v25  ;;  %v343_v29 = vld [vmem:[%s2050_s14 + $0x28] sm:$0xff]  ;;  %v350_v31 = vunpack.c.l.s8.bf16 %v338_v28  ;;  %v354_v32 = vunpack.c.h.s8.bf16 %v339_v22  ;;  %v342_v36 = vld [vmem:[%s2050_s14 + $0x20] sm:$0xff]  ;;  %v353_v37 = vunpack.c.h.s8.bf16 %v338_v28  ;;  %v341_v42 = vld [vmem:[%s2050_s14 + $0x18] sm:$0xff]  ;;  %p1811_p3 = pnand %p1810_p13, %p1804_p10 }
  0x59   : > { %1443 = vmatprep.subr.bf16.mxu0 %v1698_v9  ;;  %v358_v34 = vunpack.c.l.s8.bf16 %v343_v29  ;;  %v346_v38 = vld [vmem:[%s2050_s14 + $0x40] sm:$0xff]  ;;  %v357_v39 = vunpack.c.l.s8.bf16 %v342_v36  ;;  %v361_v40 = vunpack.c.h.s8.bf16 %v343_v29  ;;  %v356_v43 = vunpack.c.l.s8.bf16 %v341_v42  ;;  %v349_v44 = vld [vmem:[%s2050_s14 + $0x58] sm:$0xff]  ;;  %v344_v52 = vld [vmem:[%s2050_s14 + $0x30] sm:$0xff] }
  0x5a   : > { %1538 = vmatpush3.bf16.msra.mxu1 %v1697_v8  ;;  %598 = vmatprep.mubr.bf16.mxu0 %v351_v24  ;;  %v364_v41 = vunpack.c.l.s8.bf16 %v346_v38  ;;  %v360_v45 = vunpack.c.h.s8.bf16 %v342_v36  ;;  %v367_v46 = vunpack.c.h.s8.bf16 %v346_v38  ;;  %v370_v47 = vunpack.c.l.s8.bf16 %v349_v44  ;;  %v345_v48 = vld [vmem:[%s2050_s14 + $0x38] sm:$0xff]  ;;  %v348_v55 = vld [vmem:[%s2050_s14 + $0x50] sm:$0xff]  ;;  %v347_v58 = vld [vmem:[%s2050_s14 + $0x48] sm:$0xff] }
  0x5b   : > { %1539 = vmatprep.subr.bf16.mxu1 %v1700_v11  ;;  %v359_v49 = vunpack.c.h.s8.bf16 %v341_v42  ;;  %v363_v50 = vunpack.c.l.s8.bf16 %v345_v48  ;;  %v373_v51 = vunpack.c.h.s8.bf16 %v349_v44  ;;  %v362_v53 = vunpack.c.l.s8.bf16 %v344_v52  ;;  %v1715_v62 = vld [vmem:[#allocation8 + $0x28] sm:$0xff]   ;;  %v1716_v63 = vld [vmem:[#allocation8 + $0x20] sm:$0xff]   ;;  %v1717_v0 = vld [vmem:[#allocation8 + $0x18] sm:$0xff]  }
  0x5c   : > { %1444 = vmatpush3.bf16.msra.mxu0 %v1699_v10  ;;  %v366_v54 = vunpack.c.h.s8.bf16 %v345_v48  ;;  %v365_v56 = vunpack.c.h.s8.bf16 %v344_v52  ;;  %v369_v57 = vunpack.c.l.s8.bf16 %v348_v55  ;;  %v368_v59 = vunpack.c.l.s8.bf16 %v347_v58  ;;  %v1718_v1 = vld [vmem:[#allocation8 + $0x10] sm:$0xff]   ;;  %v1719_v2 = vld [vmem:[#allocation8 + $0x8] sm:$0xff]   ;;  %v1720_v3 = vld [vmem:[#allocation8] sm:$0xff]  }
  0x5d   : > { %1445 = vmatprep.subr.bf16.mxu0 %v1701_v12  ;;  %v372_v60 = vunpack.c.h.s8.bf16 %v348_v55  ;;  %v371_v61 = vunpack.c.h.s8.bf16 %v347_v58  ;;  %v2075_v10 = vld [vmem:[%s2181_s2] ss:$0 sm:$0xff] }
  0x5e   : > { %1540 = vmatpush3.bf16.msra.mxu1 %v1700_v11 }
  0x5f   : > { %1541 = vmatprep.subr.bf16.mxu1 %v1703_v13 }
  0x60   : > { %1446 = vmatpush3.bf16.msra.mxu0 %v1702_v14 }
  0x61   : > { %1447 = vmatprep.subr.bf16.mxu0 %v1704_v15 }
  0x62   : > { %1542 = vmatpush3.bf16.msra.mxu1 %v1703_v13 }
  0x63   : > { %1543 = vmatprep.subr.bf16.mxu1 %v1706_v16 }
  0x64   : > { %1448 = vmatpush3.bf16.msra.mxu0 %v1705_v17 }
  0x65   : > { %1449 = vmatprep.subr.bf16.mxu0 %v1707_v18 }
  0x66   : > { %1544 = vmatpush3.bf16.msra.mxu1 %v1706_v16 }
  0x67   : > { %1545 = vmatprep.subr.bf16.mxu1 %v1709_v19 }
  0x68   : > { %1450 = vmatpush3.bf16.msra.mxu0 %v1708_v20 }
  0x69   : > { %1451 = vmatprep.subr.bf16.mxu0 %v1710_v21 }
  0x6a   : > { %1546 = vmatpush3.bf16.msra.mxu1 %v1709_v19 }
  0x6b   : > { %1547 = vmatprep.subr.bf16.mxu1 %v1712_v26 }
  0x6c   : > { %1452 = vmatpush3.bf16.msra.mxu0 %v1711_v27 }
  0x6e   : > { %1548 = vmatpush3.bf16.msra.mxu1 %v1712_v26 }
  0x6f   : > { %599 = vmatmul.mubr.bf16.vlgmr.msra.gmra.mxu0 %v350_v31  ;;  %1565 = vmatprep.subr.bf16.mxu1 %v1713_v30 }
  0x70   : > { %606 = vmatprep.mubr.bf16.mxu0 %v354_v32 }
  0x71   : > { %1550 = vmatmul.mubr.bf16.vlgmr.msra.gmra.mxu1 %v355_v33 }
  0x72   : > { %1553 = vmatprep.mubr.bf16.mxu1 %v358_v34  ;;  %1566 = vmatpush3.bf16.msra.mxu1 %v1713_v30 }
  0x73   : > { %1567 = vmatprep.subr.bf16.mxu1 %v1714_v35 }
  0x76   : > { %1568 = vmatpush3.bf16.msra.mxu1 %v1714_v35 }
  0x77   : > { %607 = vmatmul.mubr.bf16.gmra.mxu0 %v353_v37  ;;  %1569 = vmatprep.subr.bf16.mxu1 %v1715_v62 }
  0x78   : > { %614 = vmatprep.mubr.bf16.mxu0 %v357_v39 }
  0x79   : > { %1554 = vmatmul.mubr.bf16.gmra.mxu1 %v361_v40 }
  0x7a   : > { %1557 = vmatprep.mubr.bf16.mxu1 %v364_v41  ;;  %1570 = vmatpush3.bf16.msra.mxu1 %v1715_v62 }
  0x7b   : > { %1571 = vmatprep.subr.bf16.mxu1 %v1716_v63 }
  0x7e   : > { %1572 = vmatpush3.bf16.msra.mxu1 %v1716_v63 }
  0x7f   : > { %615 = vmatmul.mubr.bf16.gmra.mxu0 %v356_v43  ;;  %1573 = vmatprep.subr.bf16.mxu1 %v1717_v0 }
  0x80   : > { %622 = vmatprep.mubr.bf16.mxu0 %v360_v45 }
  0x81   : > { %1558 = vmatmul.mubr.bf16.gmra.mxu1 %v367_v46 }
  0x82   : > { %1561 = vmatprep.mubr.bf16.mxu1 %v370_v47  ;;  %1574 = vmatpush3.bf16.msra.mxu1 %v1717_v0 }
  0x83   : > { %1575 = vmatprep.subr.bf16.mxu1 %v1718_v1 }
  0x86   : > { %1576 = vmatpush3.bf16.msra.mxu1 %v1718_v1 }
  0x87   : > { %623 = vmatmul.mubr.bf16.gmra.mxu0 %v359_v49  ;;  %1577 = vmatprep.subr.bf16.mxu1 %v1719_v2 }
  0x88   : > { %630 = vmatprep.mubr.bf16.mxu0 %v363_v50 }
  0x89   : > { %1562 = vmatmul.mubr.bf16.gmra.mxu1 %v373_v51 }
  0x8a   : > { %1578 = vmatpush3.bf16.msra.mxu1 %v1719_v2 }
  0x8b   : > { %1579 = vmatprep.subr.bf16.mxu1 %v1720_v3 }
  0x8e   : > { %1580 = vmatpush3.bf16.msra.mxu1 %v1720_v3 }
  0x8f   : > { %631 = vmatmul.mubr.bf16.gmra.mxu0 %v362_v53 }
  0x90   : > { %638 = vmatprep.mubr.bf16.mxu0 %v366_v54 }
  0x97   : > { %639 = vmatmul.mubr.bf16.gmra.mxu0 %v365_v56 }
  0x98   : > { %646 = vmatprep.mubr.bf16.mxu0 %v369_v57 }
  0x9f   : > { %647 = vmatmul.mubr.bf16.gmra.mxu0 %v368_v59 }
  0xa0   : > { %654 = vmatprep.mubr.bf16.mxu0 %v372_v60 }
  0xa7   : > { %655 = vmatmul.mubr.bf16.gmra.mxu0 %v371_v61 }
 0x12f   : > { %v1453_v4 = vpop.f32.mrf.mxu0 }
 0x131   : > { %v1454_v5 = vpop.f32.mrf.mxu0  ;;  %v1551_v6 = vpop.f32.mrf.mxu1 }
 0x132   : > { %v1455_v7 = vadd.f32 %v1454_v5, %v1453_v4 }
 0x133   : > { %v1456_v8 = vpop.f32.mrf.mxu0  ;;  %v697_v9 = vpop.f32.mrf.mxu1 }
 0x134   : > { %v698_v11 = vadd.f32 %v1455_v7, %v697_v9 }
 0x135   : > { %v1457_v12 = vpop.f32.mrf.mxu0  ;;  %v1552_v13 = vpop.f32.mrf.mxu1 }
 0x136   : > { %v818_v14 = vadd.f32 %v2075_v10, %v698_v11  ;;  %v1458_v15 = vadd.f32 %v1457_v12, %v1456_v8 }
 0x137   : > { %v1459_v16 = vpop.f32.mrf.mxu0  ;;  %v700_v17 = vpop.f32.mrf.mxu1 }
 0x138   : > { %v701_v18 = vadd.f32 %v1458_v15, %v700_v17  ;;  %v850_v21 = vmul.f32 0.01, %v818_v14  ;;  %vm834_vm0 = vcmp.gt.f32.partialorder %v818_v14, 0.0 }
 0x139   : > { %v1460_v19 = vpop.f32.mrf.mxu0  ;;  %v1555_v20 = vpop.f32.mrf.mxu1 }
 0x13a   : > { %v819_v22 = vadd.f32 %v2075_v10, %v701_v18  ;;  %v1461_v23 = vadd.f32 %v1460_v19, %v1459_v16  ;;  %v866_v31 = vsel %vm834_vm0, %v818_v14, %v850_v21 }
 0x13b   : > { %v1462_v24 = vpop.f32.mrf.mxu0  ;;  %v713_v28 = vpop.f32.mrf.mxu1 }
 0x13c   : > { %vm835_vm1 = vcmp.gt.f32.partialorder %v819_v22, 0.0  ;;  %v851_v25 = vmul.f32 0.01, %v819_v22  ;;  %v706_v26 = vadd.f32 %v1551_v6, %v1461_v23 }
 0x13d   : > { %v1463_v27 = vpop.f32.mrf.mxu0  ;;  %v1556_v37 = vpop.f32.mrf.mxu1 }
 0x13e   : > { %v820_v29 = vadd.f32 %v2075_v10, %v706_v26  ;;  %v1464_v30 = vadd.f32 %v1463_v27, %v1462_v24  ;;  %v867_v32 = vsel %vm835_vm1, %v819_v22, %v851_v25 }
 0x13f   : > { %v1465_v33 = vpop.f32.mrf.mxu0  ;;  %v882_v34 = vpack.c.bf16 %v867_v32, %v866_v31  ;;  %v716_v45 = vpop.f32.mrf.mxu1 }
 0x140   : > { %v709_v35 = vadd.f32 %v1552_v13, %v1464_v30  ;;  %v852_v38 = vmul.f32 0.01, %v820_v29  ;;  %vm836_vm2 = vcmp.gt.f32.partialorder %v820_v29, 0.0 }
 0x141   : > { %v1466_v36 = vpop.f32.mrf.mxu0  ;;  %1581 = vmatprep.mubr.bf16.mxu1 %v882_v34  ;;  %v1559_v54 = vpop.f32.mrf.mxu1 }
 0x142   : > { %v821_v39 = vadd.f32 %v2075_v10, %v709_v35  ;;  %v1467_v40 = vadd.f32 %v1466_v36, %v1465_v33  ;;  %v868_v46 = vsel %vm836_vm2, %v820_v29, %v852_v38 }
 0x143   : > { %v1468_v41 = vpop.f32.mrf.mxu0  ;;  %v729_v62 = vpop.f32.mrf.mxu1 }
 0x144   : > { %vm837_vm3 = vcmp.gt.f32.partialorder %v821_v39, 0.0  ;;  %v853_v42 = vmul.f32 0.01, %v821_v39  ;;  %v714_v43 = vadd.f32 %v1467_v40, %v713_v28 }
 0x145   : > { %v1469_v44 = vpop.f32.mrf.mxu0  ;;  %v1560_v7 = vpop.f32.mrf.mxu1 }
 0x146   : > { %v869_v47 = vsel %vm837_vm3, %v821_v39, %v853_v42  ;;  %v822_v48 = vadd.f32 %v2075_v10, %v714_v43  ;;  %v1470_v49 = vadd.f32 %v1469_v44, %v1468_v41 }
 0x147   : > { %v883_v50 = vpack.c.bf16 %v869_v47, %v868_v46  ;;  %v1471_v51 = vpop.f32.mrf.mxu0  ;;  %v732_v16 = vpop.f32.mrf.mxu1 }
 0x148   : > { %v717_v52 = vadd.f32 %v1470_v49, %v716_v45  ;;  %v854_v55 = vmul.f32 0.01, %v822_v48  ;;  %vm838_vm4 = vcmp.gt.f32.partialorder %v822_v48, 0.0 }
 0x149   : > { %v1472_v53 = vpop.f32.mrf.mxu0  ;;  %1582 = vmatmul.mubr.bf16.vlgmr.msra.gmra.mxu1 %v883_v50  ;;  %v1563_v25 = vpop.f32.mrf.mxu1 }
 0x14a   : > { %v823_v56 = vadd.f32 %v2075_v10, %v717_v52  ;;  %v1473_v57 = vadd.f32 %v1472_v53, %v1471_v51  ;;  %v870_v1 = vsel %vm838_vm4, %v822_v48, %v854_v55 }
 0x14b   : > { %v1474_v58 = vpop.f32.mrf.mxu0  ;;  %v745_v33 = vpop.f32.mrf.mxu1 }
 0x14c   : > { %vm839_vm5 = vcmp.gt.f32.partialorder %v823_v56, 0.0  ;;  %v855_v59 = vmul.f32 0.01, %v823_v56  ;;  %v722_v60 = vadd.f32 %v1555_v20, %v1473_v57 }
 0x14d   : > { %v1475_v61 = vpop.f32.mrf.mxu0  ;;  %v1564_v42 = vpop.f32.mrf.mxu1 }
 0x14e   : > { %v824_v63 = vadd.f32 %v2075_v10, %v722_v60  ;;  %v1476_v0 = vadd.f32 %v1475_v61, %v1474_v58  ;;  %v871_v2 = vsel %vm839_vm5, %v823_v56, %v855_v59 }
 0x14f   : > { %v1477_v3 = vpop.f32.mrf.mxu0  ;;  %v884_v4 = vpack.c.bf16 %v871_v2, %v870_v1  ;;  %v748_v50 = vpop.f32.mrf.mxu1 }
 0x150   : > { %v725_v5 = vadd.f32 %v1556_v37, %v1476_v0  ;;  %v856_v8 = vmul.f32 0.01, %v824_v63  ;;  %vm840_vm6 = vcmp.gt.f32.partialorder %v824_v63, 0.0 }
 0x151   : > { %v1478_v6 = vpop.f32.mrf.mxu0  ;;  %1585 = vmatprep.mubr.bf16.mxu1 %v884_v4 }
 0x152   : > { %v825_v9 = vadd.f32 %v2075_v10, %v725_v5  ;;  %v1479_v11 = vadd.f32 %v1478_v6, %v1477_v3  ;;  %v872_v19 = vsel %vm840_vm6, %v824_v63, %v856_v8 }
 0x153   : > { %v1480_v12 = vpop.f32.mrf.mxu0 }
 0x154   : > { %v857_v13 = vmul.f32 0.01, %v825_v9  ;;  %v730_v14 = vadd.f32 %v1479_v11, %v729_v62  ;;  %vm841_vm7 = vcmp.gt.f32.partialorder %v825_v9, 0.0 }
 0x155   : > { %v1481_v15 = vpop.f32.mrf.mxu0 }
 0x156   : > { %v826_v17 = vadd.f32 %v2075_v10, %v730_v14  ;;  %v1482_v18 = vadd.f32 %v1481_v15, %v1480_v12  ;;  %v873_v20 = vsel %vm841_vm7, %v825_v9, %v857_v13  ;;  %v2096_v15 = vld [vmem:[%s2183_s4] ss:$0 sm:$0xff] }
 0x157   : > { %v1483_v21 = vpop.f32.mrf.mxu0  ;;  %v885_v22 = vpack.c.bf16 %v873_v20, %v872_v19 }
 0x158   : > { %v733_v23 = vadd.f32 %v1482_v18, %v732_v16  ;;  %v858_v26 = vmul.f32 0.01, %v826_v17  ;;  %vm842_vm8 = vcmp.gt.f32.partialorder %v826_v17, 0.0 }
 0x159   : > { %v1484_v24 = vpop.f32.mrf.mxu0  ;;  %1586 = vmatmul.mubr.bf16.gmra.mxu1 %v885_v22 }
 0x15a   : > { %v827_v27 = vadd.f32 %v2075_v10, %v733_v23  ;;  %v1485_v28 = vadd.f32 %v1484_v24, %v1483_v21  ;;  %v874_v36 = vsel %vm842_vm8, %v826_v17, %v858_v26 }
 0x15b   : > { %v1486_v29 = vpop.f32.mrf.mxu0 }
 0x15c   : > { %vm843_vm9 = vcmp.gt.f32.partialorder %v827_v27, 0.0  ;;  %v859_v30 = vmul.f32 0.01, %v827_v27  ;;  %v738_v31 = vadd.f32 %v1559_v54, %v1485_v28 }
 0x15d   : > { %v1487_v32 = vpop.f32.mrf.mxu0 }
 0x15e   : > { %v828_v34 = vadd.f32 %v2075_v10, %v738_v31  ;;  %v1488_v35 = vadd.f32 %v1487_v32, %v1486_v29  ;;  %v875_v37 = vsel %vm843_vm9, %v827_v27, %v859_v30 }
 0x15f   : > { %v1489_v38 = vpop.f32.mrf.mxu0  ;;  %v886_v39 = vpack.c.bf16 %v875_v37, %v874_v36 }
 0x160   : > { %v741_v40 = vadd.f32 %v1560_v7, %v1488_v35  ;;  %v860_v43 = vmul.f32 0.01, %v828_v34  ;;  %vm844_vm10 = vcmp.gt.f32.partialorder %v828_v34, 0.0 }
 0x161   : > { %v1490_v41 = vpop.f32.mrf.mxu0  ;;  %1589 = vmatprep.mubr.bf16.mxu1 %v886_v39 }
 0x162   : > { %v829_v44 = vadd.f32 %v2075_v10, %v741_v40  ;;  %v1491_v45 = vadd.f32 %v1490_v41, %v1489_v38  ;;  %v876_v53 = vsel %vm844_vm10, %v828_v34, %v860_v43 }
 0x163   : > { %v1492_v46 = vpop.f32.mrf.mxu0 }
 0x164   : > { %v861_v47 = vmul.f32 0.01, %v829_v44  ;;  %v746_v48 = vadd.f32 %v1491_v45, %v745_v33  ;;  %vm845_vm11 = vcmp.gt.f32.partialorder %v829_v44, 0.0 }
 0x165   : > { %v1493_v49 = vpop.f32.mrf.mxu0 }
 0x166   : > { %v830_v51 = vadd.f32 %v2075_v10, %v746_v48  ;;  %v1494_v52 = vadd.f32 %v1493_v49, %v1492_v46  ;;  %v877_v54 = vsel %vm845_vm11, %v829_v44, %v861_v47 }
 0x167   : > { %v1495_v55 = vpop.f32.mrf.mxu0  ;;  %v887_v56 = vpack.c.bf16 %v877_v54, %v876_v53 }
 0x168   : > { %v749_v57 = vadd.f32 %v1494_v52, %v748_v50  ;;  %v862_v59 = vmul.f32 0.01, %v830_v51  ;;  %vm846_vm12 = vcmp.gt.f32.partialorder %v830_v51, 0.0 }
 0x169   : > { %v1496_v58 = vpop.f32.mrf.mxu0  ;;  %1590 = vmatmul.mubr.bf16.gmra.mxu1 %v887_v56 }
 0x16a   : > { %v831_v60 = vadd.f32 %v2075_v10, %v749_v57  ;;  %v1497_v61 = vadd.f32 %v1496_v58, %v1495_v55  ;;  %v878_v4 = vsel %vm846_vm12, %v830_v51, %v862_v59 }
 0x16b   : > { %v1498_v62 = vpop.f32.mrf.mxu0 }
 0x16c   : > { %vm847_vm13 = vcmp.gt.f32.partialorder %v831_v60, 0.0  ;;  %v863_v63 = vmul.f32 0.01, %v831_v60  ;;  %v754_v0 = vadd.f32 %v1563_v25, %v1497_v61 }
 0x16d   : > { %v1499_v1 = vpop.f32.mrf.mxu0 }
 0x16e   : > { %v832_v2 = vadd.f32 %v2075_v10, %v754_v0  ;;  %v1500_v3 = vadd.f32 %v1499_v1, %v1498_v62  ;;  %v879_v5 = vsel %vm847_vm13, %v831_v60, %v863_v63 }
 0x16f   : > { %v888_v6 = vpack.c.bf16 %v879_v5, %v878_v4 }
 0x170   : > { %v757_v7 = vadd.f32 %v1564_v42, %v1500_v3  ;;  %v864_v8 = vmul.f32 0.01, %v832_v2  ;;  %vm848_vm14 = vcmp.gt.f32.partialorder %v832_v2, 0.0 }
 0x171   : > { %1593 = vmatprep.mubr.bf16.mxu1 %v888_v6 }
 0x172   : > { %v833_v9 = vadd.f32 %v2075_v10, %v757_v7  ;;  %v880_v12 = vsel %vm848_vm14, %v832_v2, %v864_v8 }
 0x174   : > { %v865_v11 = vmul.f32 0.01, %v833_v9  ;;  %vm849_vm15 = vcmp.gt.f32.partialorder %v833_v9, 0.0 }
 0x176   : > { %v881_v13 = vsel %vm849_vm15, %v833_v9, %v865_v11 }
 0x177   : > { %v889_v14 = vpack.c.bf16 %v881_v13, %v880_v12 }
 0x179   : > { %1594 = vmatmul.mubr.bf16.gmra.mxu1 %v889_v14 }
 0x209   : > { %v1583_v16 = vpop.f32.mrf.mxu1 }
 0x20a   : > { %v1004_v17 = vadd.f32 %v1583_v16, %v2096_v15 }
 0x20b   : > { %v995_v18 = vpop.f32.mrf.mxu1 }
 0x20c   : > { %v996_v19 = vadd.f32 %v2096_v15, %v995_v18  ;;  %v1076_v20 = vmul.f32 0.01, %v1004_v17  ;;  %vm1060_vm0 = vcmp.gt.f32.partialorder %v1004_v17, 0.0 }
 0x20d   : > { %v1584_v10 = vpop.f32.mrf.mxu1 }
 0x20e   : > { %v1007_v21 = vadd.f32 %v1584_v10, %v2096_v15  ;;  %v1074_v23 = vmul.f32 0.01, %v996_v19  ;;  %vm1058_vm2 = vcmp.gt.f32.partialorder %v996_v19, 0.0  ;;  %v1092_v26 = vsel %vm1060_vm0, %v1004_v17, %v1076_v20 }
 0x20f   : > { %v998_v22 = vpop.f32.mrf.mxu1 }
 0x210   : > { %vm1061_vm1 = vcmp.gt.f32.partialorder %v1007_v21, 0.0  ;;  %v1077_v24 = vmul.f32 0.01, %v1007_v21  ;;  %v999_v25 = vadd.f32 %v2096_v15, %v998_v22  ;;  %v1090_v30 = vsel %vm1058_vm2, %v996_v19, %v1074_v23 }
 0x212   : > { %v1093_v27 = vsel %vm1061_vm1, %v1007_v21, %v1077_v24  ;;  %vm1059_vm3 = vcmp.gt.f32.partialorder %v999_v25, 0.0  ;;  %v1075_v28 = vmul.f32 0.01, %v999_v25 }
 0x213   : > { %v1398_v29 = vpack.c.bf16 %v1093_v27, %v1092_v26 }
 0x214   : > { %v1091_v31 = vsel %vm1059_vm3, %v999_v25, %v1075_v28 }
 0x215   : > { %1430 = vst [vmem:[%s2103_s16 + $0x8] sm:$0xff] %v1398_v29   ;;  %v1393_v32 = vpack.c.bf16 %v1091_v31, %v1090_v30 }
 0x217   : > { %1394 = vst [vmem:[%s2103_s16] sm:$0xff] %v1393_v32  }
 0x219   : > { %v1587_v33 = vpop.f32.mrf.mxu1 }
 0x21a   : > { %v1020_v34 = vadd.f32 %v1587_v33, %v2096_v15 }
 0x21b   : > { %v1011_v35 = vpop.f32.mrf.mxu1 }
 0x21c   : > { %v1012_v36 = vadd.f32 %v2096_v15, %v1011_v35  ;;  %v1080_v38 = vmul.f32 0.01, %v1020_v34  ;;  %vm1064_vm4 = vcmp.gt.f32.partialorder %v1020_v34, 0.0 }
 0x21d   : > { %v1588_v37 = vpop.f32.mrf.mxu1 }
 0x21e   : > { %v1023_v39 = vadd.f32 %v1588_v37, %v2096_v15  ;;  %v1078_v41 = vmul.f32 0.01, %v1012_v36  ;;  %vm1062_vm6 = vcmp.gt.f32.partialorder %v1012_v36, 0.0  ;;  %v1096_v44 = vsel %vm1064_vm4, %v1020_v34, %v1080_v38 }
 0x21f   : > { %v1014_v40 = vpop.f32.mrf.mxu1 }
 0x220   : > { %vm1065_vm5 = vcmp.gt.f32.partialorder %v1023_v39, 0.0  ;;  %v1081_v42 = vmul.f32 0.01, %v1023_v39  ;;  %v1015_v43 = vadd.f32 %v2096_v15, %v1014_v40  ;;  %v1094_v48 = vsel %vm1062_vm6, %v1012_v36, %v1078_v41 }
 0x222   : > { %v1097_v45 = vsel %vm1065_vm5, %v1023_v39, %v1081_v42  ;;  %vm1063_vm7 = vcmp.gt.f32.partialorder %v1015_v43, 0.0  ;;  %v1079_v46 = vmul.f32 0.01, %v1015_v43 }
 0x223   : > { %v1408_v47 = vpack.c.bf16 %v1097_v45, %v1096_v44 }
 0x224   : > { %v1095_v49 = vsel %vm1063_vm7, %v1015_v43, %v1079_v46 }
 0x225   : > { %1432 = vst [vmem:[%s2103_s16 + $0x18] sm:$0xff] %v1408_v47   ;;  %v1403_v50 = vpack.c.bf16 %v1095_v49, %v1094_v48 }
 0x227   : > { %1431 = vst [vmem:[%s2103_s16 + $0x10] sm:$0xff] %v1403_v50  }
 0x229   : > { %v1591_v51 = vpop.f32.mrf.mxu1 }
 0x22a   : > { %v1036_v52 = vadd.f32 %v1591_v51, %v2096_v15 }
 0x22b   : > { %v1027_v53 = vpop.f32.mrf.mxu1 }
 0x22c   : > { %v1028_v54 = vadd.f32 %v2096_v15, %v1027_v53  ;;  %v1084_v56 = vmul.f32 0.01, %v1036_v52  ;;  %vm1068_vm8 = vcmp.gt.f32.partialorder %v1036_v52, 0.0 }
 0x22d   : > { %v1592_v55 = vpop.f32.mrf.mxu1 }
 0x22e   : > { %v1039_v57 = vadd.f32 %v1592_v55, %v2096_v15  ;;  %v1082_v59 = vmul.f32 0.01, %v1028_v54  ;;  %vm1066_vm10 = vcmp.gt.f32.partialorder %v1028_v54, 0.0  ;;  %v1100_v62 = vsel %vm1068_vm8, %v1036_v52, %v1084_v56 }
 0x22f   : > { %v1030_v58 = vpop.f32.mrf.mxu1 }
 0x230   : > { %vm1069_vm9 = vcmp.gt.f32.partialorder %v1039_v57, 0.0  ;;  %v1085_v60 = vmul.f32 0.01, %v1039_v57  ;;  %v1031_v61 = vadd.f32 %v2096_v15, %v1030_v58  ;;  %v1098_v2 = vsel %vm1066_vm10, %v1028_v54, %v1082_v59 }
 0x232   : > { %v1101_v63 = vsel %vm1069_vm9, %v1039_v57, %v1085_v60  ;;  %vm1067_vm11 = vcmp.gt.f32.partialorder %v1031_v61, 0.0  ;;  %v1083_v0 = vmul.f32 0.01, %v1031_v61 }
 0x233   : > { %v1418_v1 = vpack.c.bf16 %v1101_v63, %v1100_v62 }
 0x234   : > { %v1099_v3 = vsel %vm1067_vm11, %v1031_v61, %v1083_v0 }
 0x235   : > { %1434 = vst [vmem:[%s2103_s16 + $0x28] sm:$0xff] %v1418_v1   ;;  %v1413_v4 = vpack.c.bf16 %v1099_v3, %v1098_v2 }
 0x237   : > { %1433 = vst [vmem:[%s2103_s16 + $0x20] sm:$0xff] %v1413_v4  }
 0x239   : > { %v1595_v5 = vpop.f32.mrf.mxu1 }
 0x23a   : > { %v1052_v6 = vadd.f32 %v1595_v5, %v2096_v15 }
 0x23b   : > { %v1043_v7 = vpop.f32.mrf.mxu1 }
 0x23c   : > { %v1044_v8 = vadd.f32 %v2096_v15, %v1043_v7  ;;  %v1088_v11 = vmul.f32 0.01, %v1052_v6  ;;  %vm1072_vm12 = vcmp.gt.f32.partialorder %v1052_v6, 0.0 }
 0x23d   : > { %v1596_v9 = vpop.f32.mrf.mxu1 }
 0x23e   : > { %v1055_v12 = vadd.f32 %v1596_v9, %v2096_v15  ;;  %v1086_v14 = vmul.f32 0.01, %v1044_v8  ;;  %vm1070_vm14 = vcmp.gt.f32.partialorder %v1044_v8, 0.0  ;;  %v1104_v18 = vsel %vm1072_vm12, %v1052_v6, %v1088_v11 }
 0x23f   : > { %v1046_v13 = vpop.f32.mrf.mxu1 }
 0x240   : > { %vm1073_vm13 = vcmp.gt.f32.partialorder %v1055_v12, 0.0  ;;  %v1089_v16 = vmul.f32 0.01, %v1055_v12  ;;  %v1047_v17 = vadd.f32 %v2096_v15, %v1046_v13  ;;  %v1102_v21 = vsel %vm1070_vm14, %v1044_v8, %v1086_v14 }
 0x242   : > { %v1105_v19 = vsel %vm1073_vm13, %v1055_v12, %v1089_v16  ;;  %vm1071_vm15 = vcmp.gt.f32.partialorder %v1047_v17, 0.0  ;;  %v1087_v10 = vmul.f32 0.01, %v1047_v17 }
 0x243   : > { %v1428_v20 = vpack.c.bf16 %v1105_v19, %v1104_v18 }
 0x244   : > { %v1103_v22 = vsel %vm1071_vm15, %v1047_v17, %v1087_v10 }
 0x245   : > { %1436 = vst [vmem:[%s2103_s16 + $0x38] sm:$0xff] %v1428_v20   ;;  %v1423_v15 = vpack.c.bf16 %v1103_v22, %v1102_v21 }
 0x247   : > { %1435 = vst [vmem:[%s2103_s16 + $0x30] sm:$0xff] %v1423_v15  }
 0x248   : > { %1814 = shalt.err (!%p1811_p3)
}
 0x249   : > { %s1815_s14 = scalar_lea.hbm %s2128_s6, 1024  ;;  %s1819_s30 = scalar_lea.hbm %s2184_s5, 3072 }
 0x24a   : > { %p1816_p0 = scmp.ne.s32.totalorder %s2128_s6, %s1815_s14  ;;  %p1820_p6 = scmp.lt.s32.totalorder %s2128_s6, %s2184_s5 }
 0x24b   : > { %p1821_p11 = scmp.lt.s32.totalorder %s1819_s30, %s1815_s14 }
 0x24c   : > { %p1817_p1 = pnand %p1816_p0, %p2021_p7 }
 0x24d   : > { %p1822_p5 = por %p1821_p11, %p1820_p6 }
 0x24e   : > { %p1818_p4 = pneg %p1817_p1 }
 0x250   : > { %p1823_p8 = pnand %p1822_p5, %p1818_p4 }
 0x252   : > { %1826 = shalt.err (!%p1823_p8)
}
 0x253   : > { %s1895_s16 = smov 64   ;;  %s1896_s27 = smov 4  }
 0x254   : > { %1610 = dma.vmem_to_hbm [thread:$0]  (%p2021_p7), %s2130_s17, 1024, %s2128_s6, %s1187_s21, %s1895_s16, %s1895_s16, %s1896_s27  }
 0x255 PF: > { %p1632_p9 = scmp.ge.s32.totalorder %s1885_s23, 2  ;;  %s1215_s24 = sand.u32 1, %s1865_s18  }
 0x256   : > { %p2202_p10 = scmp.ne.s32.totalorder %s2193_s29, 0  ;;  %s1216_s8 = scalar_lea.sflag [#allocation5], %s1215_s24 }
 0x258   : > { %p1624_p2 = pnand %p1632_p9, %p2202_p10 }
 0x25a   : > { %p1625_p12 = pneg %p1624_p2 }
 0x25c   : > { %1860 = dma.done.wait (%p1625_p12), %s1216_s8, 1024  }
 0x25d   : > { %1862 = vsyncadd (%p1625_p12), %s1216_s8, 4294966272  ;;  %s22_s23 = sadd.s32 1, %s1885_s23   ;;  %s2203_s18 = smov %s1869_s19 }
 0x25e   : > { %p19_p13 = scmp.ge.s32.totalorder %s22_s23, 5   ;;  %s2204_s19 = smov %s1873_s20 }
 0x25f   : > { %s2205_s20 = smov %s2033_s12  ;;  %s2206_s21 = smov %s1881_s22 }
 0x260   : > { %s2207_s22 = smov %s2209_s25  ;;  %21 = sbr.rel (!%p19_p13) target bundleno = 10 (0xa), region = 102 }
 0x265   :  { %1221 = vsyncpa [#allocation4], 1 }
 0x266   :  { %1223 = vsyncpa [#allocation4 + $0x1], 1 }
 0x267   :  { %1224 = vsyncpa [#allocation7], 1 }
 0x268   :  { %1225 = vsyncpa [#allocation5], 1 }
 0x269   :  { %1227 = vsyncpa [#allocation5 + $0x1], 1 }

</bundles_post_ra>
